<compile_context>
chip_gen: v7x
topology: tpu7x:2x2x1
jax: 0.10.0
libtpu: 0.0.40
codegen_flags: <defaults>
</compile_context>

<pallas_src>
import jax
import jax.numpy as jnp
from jax.experimental import pallas as pl
from jax.experimental.pallas import tpu as pltpu

EMB_DIM = 97            # embedding / linear output width
NUM_CAT = 20            # Embedding(20, emb_dim)
FEAT_IN = 199           # Linear(199, emb_dim)
X_COLS = 1 + FEAT_IN    # 200 input columns (categorical + continuous)
OUT_PAD = 128           # lane-padded weight width (97 -> 128)
CAT_PAD = 32            # padded one-hot / table rows (20 -> 32)


def _round_up(v, m):
    return ((v + m - 1) // m) * m


def _rec_encoder_kernel(x_ref, emb_ref, w_ref, out_ref):
    # x_ref  : [T, 200]  input rows (col 0 = categorical id), any float dtype
    # emb_ref: [32, 128] zero-padded embedding table (bias already folded in)
    # w_ref  : [200,128] Linear weight^T with zero row 0 + zero-padded lanes
    # out_ref: [T, 97]   f32
    x = x_ref[...].astype(jnp.float32)

    # Linear(199,97): row 0 of w_ref is all zeros, so the categorical column
    # (lane 0 of x) contributes nothing -> no unaligned x[:,1:] slice needed.
    acc = jnp.dot(x, w_ref[...], preferred_element_type=jnp.float32)     # [T,128]

    # Embedding(20,97) gather realized as one-hot @ table on the MXU.
    ids = x[:, 0:1].astype(jnp.int32)                                     # [T,1]
    iota = jax.lax.broadcasted_iota(jnp.int32, (x.shape[0], CAT_PAD), 1)
    onehot = (iota == ids).astype(jnp.float32)                            # [T,32]
    acc = acc + jnp.dot(onehot, emb_ref[...],
                        preferred_element_type=jnp.float32)               # [T,128]

    out_ref[...] = acc[:, :EMB_DIM]


def prepare_params(emb_table, lin_w, lin_b):
    """One-time packing of PyTorch-layout params (model-load time, not per call)."""
    # Linear weight: transpose to [199,97], prepend a zero row for the
    # categorical column, zero-pad output lanes 97 -> 128.
    w = jnp.zeros((X_COLS, OUT_PAD), jnp.float32)
    w = w.at[1:, :EMB_DIM].set(lin_w.T.astype(jnp.float32))
    # Embedding table: pad 20 -> 32 rows, 97 -> 128 lanes; fold the bias into
    # every valid row so onehot @ (emb + b) == emb[id] + b.
    emb = jnp.zeros((CAT_PAD, OUT_PAD), jnp.float32)
    emb = emb.at[:NUM_CAT, :EMB_DIM].set(
        emb_table.astype(jnp.float32) + lin_b.astype(jnp.float32)[None, :])
    return emb, w


def rec_encoder_forward(x, emb_pad, w_pad, *, tile_n=4096):
    """x: [N, 200] float (f32 or bf16). Returns [N, 97] float32."""
    n = x.shape[0]

    # Row tile: multiple of 8, capped at ~N/2 so the grid has >=2 steps
    # (v7x megacore); the whole (tiny) batch as one block when N <= 8.
    if n <= 8:
        tn = n
    else:
        tn = min(int(tile_n), _round_up(pl.cdiv(n, 2), 8))
        tn = _round_up(max(tn, 8), 8)
    grid = (pl.cdiv(n, tn),)

    itemsize = jnp.dtype(x.dtype).itemsize
    x_block = tn * _round_up(X_COLS, 128) * itemsize   # x block lane-pads 200 -> 256
    out_block = tn * _round_up(EMB_DIM, 128) * 4       # out block lane-pads 97 -> 128
    w_bytes = (X_COLS + CAT_PAD) * OUT_PAD * 4
    # 2x double-buffered I/O blocks + resident weights + headroom for the
    # whole-tile temporaries (loaded x, acc, one-hot) that Mosaic stages in VMEM.
    vmem_limit = 2 * (x_block + out_block) + 2 * w_bytes + 4 * x_block + (4 << 20)
    vmem_limit = int(min(max(vmem_limit, 32 << 20), 64 << 20))

    cost = pl.CostEstimate(
        flops=2 * n * (X_COLS + CAT_PAD) * OUT_PAD,
        transcendentals=0,
        bytes_accessed=(n * X_COLS * itemsize          # x in
                        + n * EMB_DIM * 4              # out
                        + (X_COLS + CAT_PAD) * OUT_PAD * 4),  # weights
    )

    return pl.pallas_call(
        _rec_encoder_kernel,
        out_shape=jax.ShapeDtypeStruct((n, EMB_DIM), jnp.float32),
        grid=grid,
        in_specs=[
            pl.BlockSpec((tn, X_COLS), lambda i: (i, 0)),         # x tile
            pl.BlockSpec((CAT_PAD, OUT_PAD), lambda i: (0, 0)),   # emb (VMEM-resident)
            pl.BlockSpec((X_COLS, OUT_PAD), lambda i: (0, 0)),    # W   (VMEM-resident)
        ],
        out_specs=pl.BlockSpec((tn, EMB_DIM), lambda i: (i, 0)),
        compiler_params=pltpu.CompilerParams(
            dimension_semantics=("parallel",),
            vmem_limit_bytes=vmem_limit),
        cost_estimate=cost,
    )(x, emb_pad, w_pad)


def _reference(x, emb_table, lin_w, lin_b):
    xf = x.astype(jnp.float32)
    idx = xf[:, 0].astype(jnp.int32)
    return emb_table[idx] + (jnp.dot(xf[:, 1:], lin_w.T) + lin_b)


def _quantize(v, scale):
    # Snap values to multiples of 1/scale so every matmul operand (and the
    # folded emb+bias table) is exactly bf16-representable.  This makes the
    # kernel-vs-reference check independent of which f32 matmul precision
    # (single bf16 pass vs multi-pass) the Mosaic / XLA backends pick.
    return jnp.round(v * scale) / scale


if __name__ == "__main__":
    key = jax.random.PRNGKey(0)
    k_emb, k_w, k_b, k_idx, k_feat, k_idx2, k_feat2 = jax.random.split(key, 7)

    # Parameters with the PyTorch module's shapes (values quantized, see _quantize).
    emb_table = _quantize(
        jax.random.uniform(k_emb, (NUM_CAT, EMB_DIM), jnp.float32, -1.5, 1.5), 32.0)
    bound = 1.0 / (FEAT_IN ** 0.5)
    lin_w = _quantize(
        jax.random.uniform(k_w, (EMB_DIM, FEAT_IN), jnp.float32, -bound, bound), 256.0)
    lin_b = _quantize(
        jax.random.uniform(k_b, (EMB_DIM,), jnp.float32, -0.06, 0.06), 32.0)

    # One-time weight packing (hoisted out of the hot path).
    emb_pad, w_pad = prepare_params(emb_table, lin_w, lin_b)

    # --- case 1: small batch of 8 rows (single block) ---
    N = 8
    cat_ids = jax.random.randint(k_idx, (N, 1), 0, NUM_CAT).astype(jnp.float32)
    feats = _quantize(jax.random.uniform(k_feat, (N, FEAT_IN), jnp.float32, -2.0, 2.0), 32.0)
    x = jnp.concatenate([cat_ids, feats], axis=1)           # [8, 200]

    out = jax.block_until_ready(rec_encoder_forward(x, emb_pad, w_pad))
    ref = _reference(x, emb_table, lin_w, lin_b)
    assert out.shape == (N, EMB_DIM)
    assert jnp.allclose(out, ref, atol=1e-4, rtol=1e-4), float(jnp.abs(out - ref).max())

    # --- case 2: multi-step grid with a ragged (unpadded) last tile ---
    N2 = 300
    cat_ids2 = jax.random.randint(k_idx2, (N2, 1), 0, NUM_CAT).astype(jnp.float32)
    feats2 = _quantize(jax.random.uniform(k_feat2, (N2, FEAT_IN), jnp.float32, -2.0, 2.0), 32.0)
    x2 = jnp.concatenate([cat_ids2, feats2], axis=1)        # [300, 200]

    out2 = jax.block_until_ready(rec_encoder_forward(x2, emb_pad, w_pad, tile_n=128))
    ref2 = _reference(x2, emb_table, lin_w, lin_b)
    assert out2.shape == (N2, EMB_DIM)
    assert jnp.allclose(out2, ref2, atol=1e-4, rtol=1e-4), float(jnp.abs(out2 - ref2).max())

    print("KERNEL_OK")
</pallas_src>

<mosaic_0001>
module attributes {stable_mosaic.version = 11 : i64} {
  func.func @_rec_encoder_kernel(%arg0: i32, %arg1: memref<8x200xf32, #tpu.memory_space<vmem>>, %arg2: memref<32x128xf32, #tpu.memory_space<vmem>>, %arg3: memref<200x128xf32, #tpu.memory_space<vmem>>, %arg4: memref<8x97xf32, #tpu.memory_space<vmem>>) attributes {dimension_semantics = [#tpu.dimension_semantics<parallel>], iteration_bounds = array<i64: 1>, scalar_prefetch = 0 : i64, scratch_operands = 0 : i64, tpu.core_type = #tpu.core_type<tc>, window_params = [{transform_indices = @transform_0, window_bounds = array<i64: 8, 200>}, {pipeline_mode = #tpu.pipeline_mode<synchronous>, transform_indices = @transform_1, window_bounds = array<i64: 32, 128>}, {pipeline_mode = #tpu.pipeline_mode<synchronous>, transform_indices = @transform_2, window_bounds = array<i64: 200, 128>}, {transform_indices = @transform_3, window_bounds = array<i64: 8, 97>}]} {
    %c0 = arith.constant 0 : index
    %c0_0 = arith.constant 0 : index
    %0 = vector.load %arg1[%c0, %c0_0] : memref<8x200xf32, #tpu.memory_space<vmem>>, vector<8x200xf32>
    %c0_1 = arith.constant 0 : index
    %c0_2 = arith.constant 0 : index
    %1 = vector.load %arg3[%c0_1, %c0_2] : memref<200x128xf32, #tpu.memory_space<vmem>>, vector<200x128xf32>
    %cst = arith.constant dense<0.000000e+00> : vector<8x128xf32>
    %2 = tpu.matmul %0, %1, %cst {dimension_numbers = #tpu.dot_dimension_numbers<[1], [0], [0], [1], [0, 0, 1, 1], [], []>} : vector<8x200xf32>, vector<200x128xf32>, vector<8x128xf32> -> vector<8x128xf32>
    %3 = vector.extract_strided_slice %0 {offsets = [0, 0], sizes = [8, 1], strides = [1, 1]} : vector<8x200xf32> to vector<8x1xf32>
    %4 = arith.fptosi %3 : vector<8x1xf32> to vector<8x1xi32>
    %5 = tpu.iota {dimensions = array<i32: 1>} : vector<8x32xi32>
    %6 = vector.broadcast %4 : vector<8x1xi32> to vector<8x32xi32>
    %7 = arith.cmpi eq, %5, %6 : vector<8x32xi32>
    %8 = arith.extui %7 : vector<8x32xi1> to vector<8x32xi32>
    %9 = arith.sitofp %8 : vector<8x32xi32> to vector<8x32xf32>
    %c0_3 = arith.constant 0 : index
    %c0_4 = arith.constant 0 : index
    %10 = vector.load %arg2[%c0_3, %c0_4] : memref<32x128xf32, #tpu.memory_space<vmem>>, vector<32x128xf32>
    %cst_5 = arith.constant dense<0.000000e+00> : vector<8x128xf32>
    %11 = tpu.matmul %9, %10, %cst_5 {dimension_numbers = #tpu.dot_dimension_numbers<[1], [0], [0], [1], [0, 0, 1, 1], [], []>} : vector<8x32xf32>, vector<32x128xf32>, vector<8x128xf32> -> vector<8x128xf32>
    %12 = arith.addf %2, %11 : vector<8x128xf32>
    %13 = vector.extract_strided_slice %12 {offsets = [0, 0], sizes = [8, 97], strides = [1, 1]} : vector<8x128xf32> to vector<8x97xf32>
    %c0_6 = arith.constant 0 : index
    %c0_7 = arith.constant 0 : index
    %14 = vector.load %arg4[%c0_6, %c0_7] : memref<8x97xf32, #tpu.memory_space<vmem>>, vector<8x97xf32>
    tpu.vector_store %arg4[%c0_6, %c0_7], %13 {strides = array<i32>} : memref<8x97xf32, #tpu.memory_space<vmem>>, vector<8x97xf32>,
    return
  }
  func.func @transform_0(%arg0: i32) -> (i32, i32) {
    %c0_i32 = arith.constant 0 : i32
    %c0_i32_0 = arith.constant 0 : i32
    return %arg0, %c0_i32 : i32, i32
  }
  func.func @transform_1(%arg0: i32) -> (i32, i32) {
    %c0_i32 = arith.constant 0 : i32
    %c0_i32_0 = arith.constant 0 : i32
    %c0_i32_1 = arith.constant 0 : i32
    return %c0_i32, %c0_i32_0 : i32, i32
  }
  func.func @transform_2(%arg0: i32) -> (i32, i32) {
    %c0_i32 = arith.constant 0 : i32
    %c0_i32_0 = arith.constant 0 : i32
    %c0_i32_1 = arith.constant 0 : i32
    return %c0_i32, %c0_i32_0 : i32, i32
  }
  func.func @transform_3(%arg0: i32) -> (i32, i32) {
    %c0_i32 = arith.constant 0 : i32
    %c0_i32_0 = arith.constant 0 : i32
    return %arg0, %c0_i32 : i32, i32
  }
}

</mosaic_0001>

<bundles_post_ra>
// kernel: tpu_custom_call.1
= control target key start
LH: loop header
LB: loop body
LE: loop exit
PB: predicated region body
PF: predicated region fallthrough
CT: control target
= control target key end

     0   :  { %8 = vsyncpa [#allocation3], 0  ;;  %s534_s0 = inlined_call_operand.hbm [shape: f32[8,200], index: 0, kind: input, shape index: {}]   ;;  %s535_s1 = inlined_call_operand.hbm [shape: f32[32,128], index: 1, kind: input, shape index: {}]   ;;  %s536_s2 = inlined_call_operand.hbm [shape: f32[200,128], index: 2, kind: input, shape index: {}]   ;;  %s537_s3 = inlined_call_operand.hbm [shape: f32[8,97], index: 3, kind: output, shape index: {}]  }
   0x1   :  { %9 = vsyncpa [#allocation6], 0 }
   0x2   :  { %10 = vsyncpa [#allocation4], 0  ;;  %s429_s12 = smov [#allocation5]   ;;  %s335_s16 = scalar_lea.hbm %s535_s1, 512 }
   0x3   :  { %s26_s13 = sshll.u32 %s429_s12, 4  ;;  %p336_p0 = scmp.ne.s32.totalorder %s535_s1, %s335_s16  ;;  %s27_s13 = int_to_ptr.vmem [resolvable:$true] %s26_s13 }
   0x4   :  { %p339_p1 = scmp.lt.u32.totalorder %s335_s16, %s535_s1 }
   0x6   :  { %p341_p2 = pnand %p339_p1, %p336_p0 }
   0x8   :  { %344 = shalt.err (!%p341_p2)
}
   0x9   :  { %s345_s21 = scalar_lea.vmem %s27_s13, 512  ;;  %p350_p4 = scmp.lt.s32.totalorder %s27_s13, %s27_s13 }
   0xa   :  { %p346_p3 = scmp.ne.s32.totalorder %s27_s13, %s345_s21  ;;  %p351_p5 = scmp.lt.s32.totalorder %s345_s21, %s345_s21 }
   0xc   :  { %p352_p6 = por %p351_p5, %p350_p4 }
   0xe   :  { %p353_p7 = pnand %p352_p6, %p346_p3 }
  0x10   :  { %356 = shalt.err (!%p353_p7)
}
  0x11   :  { %s430_s22 = smov 128   ;;  %s431_s23 = smov 8  }
  0x12   :  { %32 = dma.hbm_to_vmem [thread:$0]  %s535_s1, 512, %s27_s13, [#allocation6], %s430_s22, %s430_s22, %s431_s23  }
  0x13   :  { %s432_s26 = smov [#allocation2]   ;;  %s433_s28 = smov [#allocation7]  }
  0x14   :  { %s17_s27 = sshll.u32 %s432_s26, 4  ;;  %s38_s29 = sshll.u32 %s433_s28, 4  ;;  %s18_s27 = int_to_ptr.vmem [resolvable:$true] %s17_s27  ;;  %s39_s29 = int_to_ptr.vmem [resolvable:$true] %s38_s29 }
  0x15   :  { %s357_s5 = scalar_lea.hbm %s534_s0, 256 }
  0x16   :  { %p358_p8 = scmp.ne.s32.totalorder %s534_s0, %s357_s5  ;;  %p361_p9 = scmp.lt.u32.totalorder %s357_s5, %s534_s0 }
  0x18   :  { %p363_p10 = pnand %p361_p9, %p358_p8 }
  0x1a   :  { %366 = shalt.err (!%p363_p10)
}
  0x1b   :  { %s367_s1 = scalar_lea.vmem %s18_s27, 256  ;;  %p372_p12 = scmp.lt.s32.totalorder %s18_s27, %s18_s27 }
  0x1c   :  { %p368_p11 = scmp.ne.s32.totalorder %s18_s27, %s367_s1  ;;  %p373_p13 = scmp.lt.s32.totalorder %s367_s1, %s367_s1 }
  0x1e   :  { %p374_p0 = por %p373_p13, %p372_p12 }
  0x20   :  { %p375_p1 = pnand %p374_p0, %p368_p11 }
  0x22   :  { %378 = shalt.err (!%p375_p1)
}
  0x23   :  { %20 = dma.hbm_to_vmem [thread:$0]  %s534_s0, 256, %s18_s27, [#allocation3]  }
  0x24   :  { %s379_s14 = scalar_lea.hbm %s536_s2, 3200 }
  0x25   :  { %p380_p2 = scmp.ne.s32.totalorder %s536_s2, %s379_s14  ;;  %p383_p3 = scmp.lt.u32.totalorder %s379_s14, %s536_s2 }
  0x27   :  { %p385_p4 = pnand %p383_p3, %p380_p2 }
  0x29   :  { %388 = shalt.err (!%p385_p4)
}
  0x2a   :  { %s389_s19 = scalar_lea.vmem %s39_s29, 3200  ;;  %p394_p6 = scmp.lt.s32.totalorder %s39_s29, %s39_s29 }
  0x2b   :  { %p390_p5 = scmp.ne.s32.totalorder %s39_s29, %s389_s19  ;;  %p395_p7 = scmp.lt.s32.totalorder %s389_s19, %s389_s19 }
  0x2d   :  { %p396_p8 = por %p395_p7, %p394_p6 }
  0x2f   :  { %p397_p9 = pnand %p396_p8, %p390_p5 }
  0x31   :  { %400 = shalt.err (!%p397_p9)
}
  0x32   :  { %44 = dma.hbm_to_vmem [thread:$0]  %s536_s2, 3200, %s39_s29, [#allocation6], %s430_s22, %s430_s22, %s431_s23  }
  0x33   :  { %423 = dma.done.wait [#allocation3], 256  }
  0x34   :  { %424 = vsyncadd [#allocation3], 4294967040 }
  0x35   :  { %425 = dma.done.wait [#allocation6], 3712  }
  0x36   :  { %426 = vsyncadd [#allocation6], 4294963584  ;;  %v434_v0 = vmov 0   ;;  %v435_v1 = vmov 0.0|0.0   ;;  %v503_v2 = vld [vmem:[#allocation2] sm:$0xff]  ;;  %v56_v3 = vld [vmem:[#allocation7] sm:$0xff]  ;;  %v82_v50 = vlaneseq }
  0x37   :  { %334 = vset.pattern.permute.xlu0 %v434_v0  ;;  %285 = vmatprep.subr.bf16.mxu0 %v435_v1  ;;  %v57_v4 = vld [vmem:[#allocation7 + $0x8] sm:$0xff]  ;;  %v322_v5 = vtrunc.f32 %v503_v2  ;;  %v58_v7 = vld [vmem:[#allocation7 + $0x10] sm:$0xff]  ;;  %v59_v8 = vld [vmem:[#allocation7 + $0x18] sm:$0xff]  ;;  %vm436_vm0 = vmmov 0   ;;  %v437_v13 = vmov 0.0   ;;  %vm168_vm1 = vcmask 588800  }
  0x38   :  { %279 = vmatprep.subr.bf16.mxu1 %v435_v1  ;;  %v286_v6 = vpack.c.bf16 %v57_v4, %v56_v3  ;;  %v289_v10 = vpack.c.bf16 %v59_v8, %v58_v7  ;;  %v60_v11 = vld [vmem:[#allocation7 + $0x20] sm:$0xff]  ;;  %v61_v12 = vld [vmem:[#allocation7 + $0x28] sm:$0xff]  ;;  %276 = vmatprep.mubr.msk.f32.mxu1 %vm436_vm0, %v437_v13  ;;  %v62_v16 = vld [vmem:[#allocation7 + $0x30] sm:$0xff]  ;;  %v83_v51 = vand.u32 127, %v82_v50  ;;  %vm94_vm2 = vcmask 261120   ;;  %s438_s2 = smov [#allocation8]  }
  0x39   :  { %v323_v9 = vcvt.f32.s32 %v322_v5  ;;  %v292_v14 = vpack.c.bf16 %v61_v12, %v60_v11  ;;  %v90_v15 = vld [vmem:[#allocation5] sm:$0xff]  ;;  %v63_v17 = vld [vmem:[#allocation7 + $0x38] sm:$0xff]  ;;  %v91_v18 = vld [vmem:[#allocation5 + $0x8] sm:$0xff]  ;;  %s250_s21 = sshll.u32 %s438_s2, 4  ;;  %vm242_vm4 = vcmask 793600   ;;  %s251_s21 = int_to_ptr.vmem [resolvable:$true] %s250_s21 }
  0x3a   :  { %287 = vmatpush1.bf16.msra.mxu0 %v286_v6  ;;  %v280_v19 = vpack.c.bf16 %v91_v18, %v90_v15  ;;  %v92_v20 = vld [vmem:[#allocation5 + $0x10] sm:$0xff]  ;;  %v93_v21 = vld [vmem:[#allocation5 + $0x18] sm:$0xff]  ;;  %v295_v23 = vpack.c.bf16 %v63_v17, %v62_v16  ;;  %v64_v25 = vld [vmem:[#allocation7 + $0x40] sm:$0xff]  ;;  %s401_s22 = scalar_lea.vmem %s251_s21, 128  ;;  %p406_p11 = scmp.lt.s32.totalorder %s251_s21, %s251_s21 }
  0x3b   :  { %288 = vmatprep.subr.bf16.mxu0 %v435_v1  ;;  %85 = vperm.xlu0 %334, %v323_v9   ;;  %v55_v22 = vld [vmem:[#allocation2 + $0x8] sm:$0xff]  ;;  %v283_v24 = vpack.c.bf16 %v93_v21, %v92_v20  ;;  %v65_v26 = vld [vmem:[#allocation7 + $0x48] sm:$0xff]  ;;  %v66_v28 = vld [vmem:[#allocation7 + $0x50] sm:$0xff]  ;;  %p402_p10 = scmp.ne.s32.totalorder %s251_s21, %s401_s22  ;;  %p407_p12 = scmp.lt.s32.totalorder %s401_s22, %s401_s22 }
  0x3c   :  { %281 = vmatpush3.bf16.msra.mxu1 %v280_v19  ;;  %262 = vmatprep.mubr.msk.f32.mxu0 %vm168_vm1, %v55_v22  ;;  %v298_v27 = vpack.c.bf16 %v65_v26, %v64_v25  ;;  %v67_v29 = vld [vmem:[#allocation7 + $0x58] sm:$0xff]  ;;  %v68_v31 = vld [vmem:[#allocation7 + $0x60] sm:$0xff]  ;;  %v69_v32 = vld [vmem:[#allocation7 + $0x68] sm:$0xff] }
  0x3d   :  { %282 = vmatprep.subr.bf16.mxu1 %v435_v1  ;;  %v301_v30 = vpack.c.bf16 %v67_v29, %v66_v28  ;;  %v304_v33 = vpack.c.bf16 %v69_v32, %v68_v31  ;;  %v70_v34 = vld [vmem:[#allocation7 + $0x70] sm:$0xff]  ;;  %v71_v35 = vld [vmem:[#allocation7 + $0x78] sm:$0xff]  ;;  %v72_v37 = vld [vmem:[#allocation7 + $0x80] sm:$0xff]  ;;  %p408_p13 = por %p407_p12, %p406_p11 }
  0x3e   :  { %290 = vmatpush1.bf16.msra.mxu0 %v289_v10  ;;  %v307_v36 = vpack.c.bf16 %v71_v35, %v70_v34  ;;  %v73_v38 = vld [vmem:[#allocation7 + $0x88] sm:$0xff]  ;;  %v74_v40 = vld [vmem:[#allocation7 + $0x90] sm:$0xff]  ;;  %v75_v41 = vld [vmem:[#allocation7 + $0x98] sm:$0xff] }
  0x3f   :  { %291 = vmatprep.subr.bf16.mxu0 %v435_v1  ;;  %v310_v39 = vpack.c.bf16 %v73_v38, %v72_v37  ;;  %v313_v42 = vpack.c.bf16 %v75_v41, %v74_v40  ;;  %v76_v43 = vld [vmem:[#allocation7 + $0xa0] sm:$0xff]  ;;  %v77_v44 = vld [vmem:[#allocation7 + $0xa8] sm:$0xff]  ;;  %v78_v46 = vld [vmem:[#allocation7 + $0xb0] sm:$0xff]  ;;  %p409_p0 = pnand %p408_p13, %p402_p10 }
  0x40   :  { %284 = vmatpush3.bf16.msra.mxu1 %v283_v24  ;;  %v316_v45 = vpack.c.bf16 %v77_v44, %v76_v43  ;;  %v79_v47 = vld [vmem:[#allocation7 + $0xb8] sm:$0xff]  ;;  %v80_v49 = vld [vmem:[#allocation7 + $0xc0] sm:$0xff] }
  0x41   :  { %v319_v48 = vpack.c.bf16 %v79_v47, %v78_v46 }
  0x42   :  { %293 = vmatpush1.bf16.msra.mxu0 %v292_v14 }
  0x43   :  { %294 = vmatprep.subr.bf16.mxu0 %v435_v1 }
  0x46   :  { %296 = vmatpush1.bf16.msra.mxu0 %v295_v23 }
  0x47   :  { %297 = vmatprep.subr.bf16.mxu0 %v435_v1 }
  0x4a   :  { %299 = vmatpush1.bf16.msra.mxu0 %v298_v27 }
  0x4b   :  { %300 = vmatprep.subr.bf16.mxu0 %v435_v1 }
  0x4e   :  { %302 = vmatpush1.bf16.msra.mxu0 %v301_v30 }
  0x4f   :  { %303 = vmatprep.subr.bf16.mxu0 %v435_v1 }
  0x52   :  { %305 = vmatpush1.bf16.msra.mxu0 %v304_v33 }
  0x53   :  { %306 = vmatprep.subr.bf16.mxu0 %v435_v1 }
  0x56   :  { %308 = vmatpush1.bf16.msra.mxu0 %v307_v36 }
  0x57   :  { %309 = vmatprep.subr.bf16.mxu0 %v435_v1 }
  0x5a   :  { %311 = vmatpush1.bf16.msra.mxu0 %v310_v39 }
  0x5b   :  { %312 = vmatprep.subr.bf16.mxu0 %v435_v1 }
  0x5e   :  { %314 = vmatpush1.bf16.msra.mxu0 %v313_v42 }
  0x5f   :  { %315 = vmatprep.subr.bf16.mxu0 %v435_v1 }
  0x62   :  { %317 = vmatpush1.bf16.msra.mxu0 %v316_v45 }
  0x63   :  { %318 = vmatprep.subr.bf16.mxu0 %v435_v1 }
  0x66   :  { %320 = vmatpush1.bf16.msra.mxu0 %v319_v48 }
  0x67   :  { %220 = vmatprep.subr.mxu0 %v437_v13 }
  0x6a   :  { %221 = vmatpush1.msra.mxu0 %v80_v49 }
  0x6b   :  { %237 = vmatmul.mubr.f32.vlgmr.msra.gmra.mrb[0].mxu0 %v503_v2 }
  0xba   :  { %v86_v52 = vpop.permute.xlu0 %85 }
  0xbb   :  { %vm87_vm3 = vcmp.eq.s32.totalorder %v83_v51, %v86_v52 }
  0xbc   :  { %v260_v53 = vsel %vm87_vm3, 1.0, %v437_v13 }
  0xbd   :  { %277 = vmatmul.mubr.msk.f32.vlgmr.msra.gmra.mrb[0].mxu1 %vm94_vm2, %v260_v53 }
 0x13e   :  { %v238_v54 = vpop.f32.mrb[0].mxu0 }
 0x13f   :  { %v240_v55 = vpop.f32.mrb[1].mxu0 }
 0x190   :  { %v164_v56 = vpop.f32.mrb[0].mxu1 }
 0x191   :  { %v239_v57 = vadd.f32 %v238_v54, %v164_v56  ;;  %v278_v58 = vpop.f32.mrb[1].mxu1 }
 0x193   :  { %243 = vst.msk [vmem:[#allocation8] sm:$0xff] %vm242_vm4, %v239_v57 }
 0x194   :  { %412 = shalt.err (!%p409_p0)
}
 0x195   :  { %s413_s25 = scalar_lea.hbm %s537_s3, 128 }
 0x196   :  { %p414_p1 = scmp.ne.s32.totalorder %s537_s3, %s413_s25  ;;  %p417_p2 = scmp.lt.u32.totalorder %s413_s25, %s537_s3 }
 0x198   :  { %p419_p3 = pnand %p417_p2, %p414_p1 }
 0x19a   :  { %422 = shalt.err (!%p419_p3)
}
 0x19b   :  { %253 = dma.vmem_to_hbm [thread:$0]  %s251_s21, 128, %s537_s3, [#allocation4]  }
 0x19c   :  { %427 = dma.done.wait [#allocation4], 128  }
 0x19d   :  { %428 = vsyncadd [#allocation4], 4294967168 }
 0x19e   :  { %257 = vsyncpa [#allocation3], 1 }
 0x19f   :  { %258 = vsyncpa [#allocation6], 1 }
 0x1a0   :  { %259 = vsyncpa [#allocation4], 1 }

</bundles_post_ra>
